<compile_context>
chip_gen: v6e
topology: v6e:2x2x1
jax: 0.10.0
libtpu: 0.0.40
codegen_flags: <defaults>
</compile_context>

<pallas_src>
import math
import functools

import jax
import jax.numpy as jnp
from jax import lax
from jax.experimental import pallas as pl
from jax.experimental.pallas import tpu as pltpu


def _round_up(x, m):
    return ((x + m - 1) // m) * m


# -----------------------------------------------------------------------------
# Pallas kernel: 3x3 conv on a per-tile haloed slab + bias + LeakyReLU(0.01)
# -----------------------------------------------------------------------------
def _conv3x3_bias_lrelu_kernel(x_ref, w_ref, b_ref, o_ref, im2col_ref, *,
                               cin_p, wp, tile_rows):
    """One (batch, row-tile) grid step.

    x_ref:      (1, 1, cin_p, (tile_rows+3)*wp) bf16  haloed slab, rows*cols flat on lanes
    w_ref:      (cout_p, 9*cin_p)               bf16  tap-major / cin-minor
    b_ref:      (cout_p, 1)                     f32
    o_ref:      (1, cout_p, tile_rows*wp)             conv output tile (lane-dense)
    im2col_ref: (9*cin_p, tile_rows*wp)         bf16  VMEM scratch
    """
    lt = tile_rows * wp
    # 9 static shifted windows stacked on sublanes. ky*wp is a multiple of 128
    # (pure sublane-group offset); kx in {0,1,2} is a small lane shift.
    for k in range(9):
        ky, kx = divmod(k, 3)
        start = ky * wp + kx
        im2col_ref[k * cin_p:(k + 1) * cin_p, :] = x_ref[0, 0, :, start:start + lt]
    # Single K = 9*cin_p bf16 MXU contraction, f32 accumulation.
    acc = jnp.dot(w_ref[...], im2col_ref[...], preferred_element_type=jnp.float32)
    acc = acc + b_ref[...]                               # bias broadcast over lanes
    o_ref[0, :, :] = jnp.maximum(acc, 0.01 * acc).astype(o_ref.dtype)   # LeakyReLU(0.01)


def _pick_tile_rows(h, wp):
    # Target ~1024 output lanes per MXU contraction (>= 512 per perf review) while
    # keeping per-tile im2col / accumulator / output blocks small (VMEM O(tile)).
    tr = max(1, min(64, -(-1024 // wp)))
    return int(max(1, min(tr, h)))


def conv3x3_bias_lrelu(x_nchw, w_oihw, b, *, row_tile=None):
    """3x3 'same' conv + bias + LeakyReLU(0.01) (groups=1).

    x_nchw: (N, Cin, H, W); w_oihw: (Cout, Cin, 3, 3); b: (Cout,)
    returns (N, Cout, H, W) in x_nchw.dtype
    """
    n, cin, h, w = x_nchw.shape
    cout = w_oihw.shape[0]
    out_dtype = x_nchw.dtype

    cin_p = _round_up(cin, 8)                 # full sublane groups for im2col writes
    cout_p = _round_up(cout, 8)               # full sublane groups for acc/epilogue/store
    wp = _round_up(w + 2, 128)                # lane-aligned padded row pitch

    tr = int(row_tile) if row_tile is not None else _pick_tile_rows(h, wp)
    tr = max(1, min(tr, h))
    num_tiles = -(-h // tr)                   # ceil
    hc = num_tiles * tr                       # rows rounded up to whole tiles
    hp = hc + 3                               # top halo + rows + bottom halo + guard
    lt = tr * wp                              # output lanes per tile (multiple of 128)
    ls = (tr + 3) * wp                        # slab lanes (tile rows + 2 halo + 1 guard)

    # --- wrapper layout glue (pure pad / gather / cast; fused by XLA) ---
    # TODO(synk): build the halo + overlapping slabs in-kernel via manual DMA to drop
    # this HBM pass.
    xp = jnp.pad(x_nchw.astype(jnp.bfloat16),
                 ((0, 0), (0, cin_p - cin), (1, hp - h - 1), (1, wp - w - 1)))
    row_idx = jnp.arange(num_tiles)[:, None] * tr + jnp.arange(tr + 3)[None, :]
    slabs = xp[:, :, row_idx, :]                              # (n, cin_p, T, tr+3, wp)
    slabs = slabs.transpose(0, 2, 1, 3, 4).reshape(n, num_tiles, cin_p, ls)

    # weight (Cout, Cin, 3, 3) -> (cout_p, 9*cin_p), tap-major / cin-minor, zero-padded, bf16
    w_pad = jnp.zeros((cout_p, cin_p, 3, 3), jnp.float32).at[:cout, :cin].set(
        w_oihw.astype(jnp.float32))
    w2d = w_pad.transpose(0, 2, 3, 1).reshape(cout_p, 9 * cin_p).astype(jnp.bfloat16)
    b2 = jnp.zeros((cout_p, 1), jnp.float32).at[:cout, 0].set(b.astype(jnp.float32))

    kernel = functools.partial(_conv3x3_bias_lrelu_kernel,
                               cin_p=cin_p, wp=wp, tile_rows=tr)

    out_itemsize = jnp.dtype(out_dtype).itemsize
    est = (2 * (cin_p * ls * 2 + cout_p * lt * out_itemsize
                + cout_p * 9 * cin_p * 2 + cout_p * 4)
           + 9 * cin_p * lt * 2)
    vmem_limit = int(min(64 << 20, max(32 << 20, 2 * est)))   # v7x: 64 MiB physical VMEM

    out_flat = pl.pallas_call(
        kernel,
        out_shape=jax.ShapeDtypeStruct((n, cout_p, hc * wp), out_dtype),
        grid_spec=pltpu.PrefetchScalarGridSpec(
            num_scalar_prefetch=0,
            grid=(n, num_tiles),
            in_specs=[
                pl.BlockSpec((1, 1, cin_p, ls), lambda i, t: (i, t, 0, 0)),
                pl.BlockSpec((cout_p, 9 * cin_p), lambda i, t: (0, 0)),
                pl.BlockSpec((cout_p, 1), lambda i, t: (0, 0)),
            ],
            out_specs=pl.BlockSpec((1, cout_p, lt), lambda i, t: (i, 0, t)),
            scratch_shapes=[pltpu.VMEM((9 * cin_p, lt), jnp.bfloat16)],
        ),
        compiler_params=pltpu.CompilerParams(
            dimension_semantics=("parallel", "parallel"),
            vmem_limit_bytes=vmem_limit),
    )(slabs, w2d, b2)

    # Drop padded channels / padded-width columns / row-tile ceiling rows.
    return out_flat.reshape(n, cout_p, hc, wp)[:, :cout, :h, :w]


# -----------------------------------------------------------------------------
# Glue: PixelShuffle (NCHW semantics, matches torch.nn.PixelShuffle)
# -----------------------------------------------------------------------------
def pixel_shuffle_nchw(x, r):
    n, c, h, w = x.shape
    co = c // (r * r)
    x = x.reshape(n, co, r, r, h, w)
    x = x.transpose(0, 1, 4, 2, 5, 3)
    return x.reshape(n, co, h * r, w * r)


# -----------------------------------------------------------------------------
# Parameter init (deterministic; xavier normal weights like init_w)
# -----------------------------------------------------------------------------
def make_params(key, n_channels, scale):
    """Returns (list of (weight_OIHW, bias) per conv stage, pixel-shuffle factor r)."""
    if scale in (2, 4, 8):
        n_stages, r = int(math.log(scale, 2)), 2
    elif scale == 3:
        n_stages, r = 1, 3
    else:
        n_stages, r = 0, 1

    params = []
    for s in range(n_stages):
        cout = (r * r) * n_channels
        kw, kb = jax.random.split(jax.random.fold_in(key, s))
        fan_in = n_channels * 9
        fan_out = cout * 9
        std = math.sqrt(2.0 / (fan_in + fan_out))        # xavier normal (init_w)
        wgt = std * jax.random.normal(kw, (cout, n_channels, 3, 3), jnp.float32)  # OIHW
        bound = 1.0 / math.sqrt(fan_in)                   # default Conv2d bias init
        bia = jax.random.uniform(kb, (cout,), jnp.float32, -bound, bound)
        params.append((wgt, bia))
    return params, r


# -----------------------------------------------------------------------------
# Forward pass of _UpsampleBlock
# -----------------------------------------------------------------------------
def upsample_block_forward(x_nchw, params, r, *, row_tile=None):
    out = x_nchw
    for (wgt, bia) in params:
        y = conv3x3_bias_lrelu(out, wgt, bia, row_tile=row_tile)   # Pallas hot path
        out = pixel_shuffle_nchw(y, r)                             # wrapper layout glue
        # TODO(synk): fuse pixel-shuffle into the kernel epilogue store order.
    return out


# -----------------------------------------------------------------------------
# Pure-JAX reference (for correctness checks). quantize=True mirrors the kernel's
# bf16 operands (f32 accumulation) so the comparison isolates kernel correctness.
# -----------------------------------------------------------------------------
def upsample_block_reference(x_nchw, params, r, *, quantize=False):
    out = x_nchw
    for (wgt, bia) in params:
        xin, wr = out, wgt
        if quantize:
            xin = xin.astype(jnp.bfloat16).astype(jnp.float32)
            wr = wr.astype(jnp.bfloat16).astype(jnp.float32)
        y = lax.conv_general_dilated(
            xin, wr, window_strides=(1, 1), padding="SAME",
            dimension_numbers=("NCHW", "OIHW", "NCHW"))
        y = y + bia[None, :, None, None]
        y = jnp.where(y >= 0, y, 0.01 * y)
        out = pixel_shuffle_nchw(y, r)
    return out


if __name__ == "__main__":
    key = jax.random.PRNGKey(0)
    kx, kp = jax.random.split(key)

    n_channels = 4
    n_batch, h, w = 2, 16, 16
    x = jax.random.normal(kx, (n_batch, n_channels, h, w), jnp.float32)  # NCHW like PyTorch

    # scale=4 -> two (conv3x3 -> LeakyReLU -> PixelShuffle(2)) stages; default row tiling
    # (tile_rows=8 -> 2 tiles at 16x16, 4 tiles at 32x32; grid=(batch, tiles)).
    params4, r4 = make_params(kp, n_channels, scale=4)
    out4 = jax.block_until_ready(upsample_block_forward(x, params4, r4))
    ref4q = upsample_block_reference(x, params4, r4, quantize=True)
    ref4 = upsample_block_reference(x, params4, r4)
    assert out4.shape == (n_batch, n_channels, h * 4, w * 4), out4.shape
    assert jnp.allclose(out4, ref4q, atol=5e-3, rtol=5e-3), "scale=4 mismatch vs bf16 reference"
    assert jnp.allclose(out4, ref4, atol=5e-2, rtol=5e-2), "scale=4 drift vs f32 reference"

    # scale=3 -> single stage with PixelShuffle(3) (Cout = 9*C, padded to 40 in-kernel);
    # explicit row_tile=4 exercises 4 row tiles per image.
    params3, r3 = make_params(kp, n_channels, scale=3)
    out3 = jax.block_until_ready(upsample_block_forward(x, params3, r3, row_tile=4))
    ref3q = upsample_block_reference(x, params3, r3, quantize=True)
    ref3 = upsample_block_reference(x, params3, r3)
    assert out3.shape == (n_batch, n_channels, h * 3, w * 3), out3.shape
    assert jnp.allclose(out3, ref3q, atol=5e-3, rtol=5e-3), "scale=3 mismatch vs bf16 reference"
    assert jnp.allclose(out3, ref3, atol=5e-2, rtol=5e-2), "scale=3 drift vs f32 reference"

    print("KERNEL_OK")
</pallas_src>

<mosaic_0001>
module attributes {stable_mosaic.version = 11 : i64} {
  func.func @_conv3x3_bias_lrelu_kernel(%arg0: i32, %arg1: i32, %arg2: memref<1x1x8x1408xbf16, #tpu.memory_space<vmem>>, %arg3: memref<16x72xbf16, #tpu.memory_space<vmem>>, %arg4: memref<16x1xf32, #tpu.memory_space<vmem>>, %arg5: memref<1x16x1024xf32, #tpu.memory_space<vmem>>, %arg6: memref<72x1024xbf16, #tpu.memory_space<vmem>>) attributes {dimension_semantics = [#tpu.dimension_semantics<parallel>, #tpu.dimension_semantics<parallel>], iteration_bounds = array<i64: 2, 2>, scalar_prefetch = 0 : i64, scratch_operands = 1 : i64, tpu.core_type = #tpu.core_type<tc>, window_params = [{transform_indices = @transform_0, window_bounds = array<i64: 1, 1, 8, 1408>}, {pipeline_mode = #tpu.pipeline_mode<synchronous>, transform_indices = @transform_1, window_bounds = array<i64: 16, 72>}, {pipeline_mode = #tpu.pipeline_mode<synchronous>, transform_indices = @transform_2, window_bounds = array<i64: 16, 1>}, {transform_indices = @transform_3, window_bounds = array<i64: 1, 16, 1024>}]} {
    %c0 = arith.constant 0 : index
    %c0_0 = arith.constant 0 : index
    %c0_1 = arith.constant 0 : index
    %c0_2 = arith.constant 0 : index
    %0 = vector.load %arg2[%c0, %c0_0, %c0_1, %c0_2] : memref<1x1x8x1408xbf16, #tpu.memory_space<vmem>>, vector<1x1x8x1024xbf16>
    %1 = vector.shape_cast %0 : vector<1x1x8x1024xbf16> to vector<8x1024xbf16>
    %c0_3 = arith.constant 0 : index
    %c0_4 = arith.constant 0 : index
    %2 = vector.load %arg6[%c0_3, %c0_4] : memref<72x1024xbf16, #tpu.memory_space<vmem>>, vector<8x1024xbf16>
    tpu.vector_store %arg6[%c0_3, %c0_4], %1 {strides = array<i32>} : memref<72x1024xbf16, #tpu.memory_space<vmem>>, vector<8x1024xbf16>,
    %c0_5 = arith.constant 0 : index
    %c0_6 = arith.constant 0 : index
    %c0_7 = arith.constant 0 : index
    %c1 = arith.constant 1 : index
    %3 = vector.load %arg2[%c0_5, %c0_6, %c0_7, %c1] : memref<1x1x8x1408xbf16, #tpu.memory_space<vmem>>, vector<1x1x8x1024xbf16>
    %4 = vector.shape_cast %3 : vector<1x1x8x1024xbf16> to vector<8x1024xbf16>
    %c8 = arith.constant 8 : index
    %c0_8 = arith.constant 0 : index
    %5 = vector.load %arg6[%c8, %c0_8] : memref<72x1024xbf16, #tpu.memory_space<vmem>>, vector<8x1024xbf16>
    tpu.vector_store %arg6[%c8, %c0_8], %4 {strides = array<i32>} : memref<72x1024xbf16, #tpu.memory_space<vmem>>, vector<8x1024xbf16>,
    %c0_9 = arith.constant 0 : index
    %c0_10 = arith.constant 0 : index
    %c0_11 = arith.constant 0 : index
    %c2 = arith.constant 2 : index
    %6 = vector.load %arg2[%c0_9, %c0_10, %c0_11, %c2] : memref<1x1x8x1408xbf16, #tpu.memory_space<vmem>>, vector<1x1x8x1024xbf16>
    %7 = vector.shape_cast %6 : vector<1x1x8x1024xbf16> to vector<8x1024xbf16>
    %c16 = arith.constant 16 : index
    %c0_12 = arith.constant 0 : index
    %8 = vector.load %arg6[%c16, %c0_12] : memref<72x1024xbf16, #tpu.memory_space<vmem>>, vector<8x1024xbf16>
    tpu.vector_store %arg6[%c16, %c0_12], %7 {strides = array<i32>} : memref<72x1024xbf16, #tpu.memory_space<vmem>>, vector<8x1024xbf16>,
    %c0_13 = arith.constant 0 : index
    %c0_14 = arith.constant 0 : index
    %c0_15 = arith.constant 0 : index
    %c128 = arith.constant 128 : index
    %9 = vector.load %arg2[%c0_13, %c0_14, %c0_15, %c128] : memref<1x1x8x1408xbf16, #tpu.memory_space<vmem>>, vector<1x1x8x1024xbf16>
    %10 = vector.shape_cast %9 : vector<1x1x8x1024xbf16> to vector<8x1024xbf16>
    %c24 = arith.constant 24 : index
    %c0_16 = arith.constant 0 : index
    %11 = vector.load %arg6[%c24, %c0_16] : memref<72x1024xbf16, #tpu.memory_space<vmem>>, vector<8x1024xbf16>
    tpu.vector_store %arg6[%c24, %c0_16], %10 {strides = array<i32>} : memref<72x1024xbf16, #tpu.memory_space<vmem>>, vector<8x1024xbf16>,
    %c0_17 = arith.constant 0 : index
    %c0_18 = arith.constant 0 : index
    %c0_19 = arith.constant 0 : index
    %c129 = arith.constant 129 : index
    %12 = vector.load %arg2[%c0_17, %c0_18, %c0_19, %c129] : memref<1x1x8x1408xbf16, #tpu.memory_space<vmem>>, vector<1x1x8x1024xbf16>
    %13 = vector.shape_cast %12 : vector<1x1x8x1024xbf16> to vector<8x1024xbf16>
    %c32 = arith.constant 32 : index
    %c0_20 = arith.constant 0 : index
    %14 = vector.load %arg6[%c32, %c0_20] : memref<72x1024xbf16, #tpu.memory_space<vmem>>, vector<8x1024xbf16>
    tpu.vector_store %arg6[%c32, %c0_20], %13 {strides = array<i32>} : memref<72x1024xbf16, #tpu.memory_space<vmem>>, vector<8x1024xbf16>,
    %c0_21 = arith.constant 0 : index
    %c0_22 = arith.constant 0 : index
    %c0_23 = arith.constant 0 : index
    %c130 = arith.constant 130 : index
    %15 = vector.load %arg2[%c0_21, %c0_22, %c0_23, %c130] : memref<1x1x8x1408xbf16, #tpu.memory_space<vmem>>, vector<1x1x8x1024xbf16>
    %16 = vector.shape_cast %15 : vector<1x1x8x1024xbf16> to vector<8x1024xbf16>
    %c40 = arith.constant 40 : index
    %c0_24 = arith.constant 0 : index
    %17 = vector.load %arg6[%c40, %c0_24] : memref<72x1024xbf16, #tpu.memory_space<vmem>>, vector<8x1024xbf16>
    tpu.vector_store %arg6[%c40, %c0_24], %16 {strides = array<i32>} : memref<72x1024xbf16, #tpu.memory_space<vmem>>, vector<8x1024xbf16>,
    %c0_25 = arith.constant 0 : index
    %c0_26 = arith.constant 0 : index
    %c0_27 = arith.constant 0 : index
    %c256 = arith.constant 256 : index
    %18 = vector.load %arg2[%c0_25, %c0_26, %c0_27, %c256] : memref<1x1x8x1408xbf16, #tpu.memory_space<vmem>>, vector<1x1x8x1024xbf16>
    %19 = vector.shape_cast %18 : vector<1x1x8x1024xbf16> to vector<8x1024xbf16>
    %c48 = arith.constant 48 : index
    %c0_28 = arith.constant 0 : index
    %20 = vector.load %arg6[%c48, %c0_28] : memref<72x1024xbf16, #tpu.memory_space<vmem>>, vector<8x1024xbf16>
    tpu.vector_store %arg6[%c48, %c0_28], %19 {strides = array<i32>} : memref<72x1024xbf16, #tpu.memory_space<vmem>>, vector<8x1024xbf16>,
    %c0_29 = arith.constant 0 : index
    %c0_30 = arith.constant 0 : index
    %c0_31 = arith.constant 0 : index
    %c257 = arith.constant 257 : index
    %21 = vector.load %arg2[%c0_29, %c0_30, %c0_31, %c257] : memref<1x1x8x1408xbf16, #tpu.memory_space<vmem>>, vector<1x1x8x1024xbf16>
    %22 = vector.shape_cast %21 : vector<1x1x8x1024xbf16> to vector<8x1024xbf16>
    %c56 = arith.constant 56 : index
    %c0_32 = arith.constant 0 : index
    %23 = vector.load %arg6[%c56, %c0_32] : memref<72x1024xbf16, #tpu.memory_space<vmem>>, vector<8x1024xbf16>
    tpu.vector_store %arg6[%c56, %c0_32], %22 {strides = array<i32>} : memref<72x1024xbf16, #tpu.memory_space<vmem>>, vector<8x1024xbf16>,
    %c0_33 = arith.constant 0 : index
    %c0_34 = arith.constant 0 : index
    %c0_35 = arith.constant 0 : index
    %c258 = arith.constant 258 : index
    %24 = vector.load %arg2[%c0_33, %c0_34, %c0_35, %c258] : memref<1x1x8x1408xbf16, #tpu.memory_space<vmem>>, vector<1x1x8x1024xbf16>
    %25 = vector.shape_cast %24 : vector<1x1x8x1024xbf16> to vector<8x1024xbf16>
    %c64 = arith.constant 64 : index
    %c0_36 = arith.constant 0 : index
    %26 = vector.load %arg6[%c64, %c0_36] : memref<72x1024xbf16, #tpu.memory_space<vmem>>, vector<8x1024xbf16>
    tpu.vector_store %arg6[%c64, %c0_36], %25 {strides = array<i32>} : memref<72x1024xbf16, #tpu.memory_space<vmem>>, vector<8x1024xbf16>,
    %c0_37 = arith.constant 0 : index
    %c0_38 = arith.constant 0 : index
    %27 = vector.load %arg3[%c0_37, %c0_38] : memref<16x72xbf16, #tpu.memory_space<vmem>>, vector<16x72xbf16>
    %c0_39 = arith.constant 0 : index
    %c0_40 = arith.constant 0 : index
    %28 = vector.load %arg6[%c0_39, %c0_40] : memref<72x1024xbf16, #tpu.memory_space<vmem>>, vector<72x1024xbf16>
    %cst = arith.constant dense<0.000000e+00> : vector<16x1024xf32>
    %29 = tpu.matmul %27, %28, %cst {dimension_numbers = #tpu.dot_dimension_numbers<[1], [0], [0], [1], [0, 0, 1, 1], [], []>} : vector<16x72xbf16>, vector<72x1024xbf16>, vector<16x1024xf32> -> vector<16x1024xf32>
    %c0_41 = arith.constant 0 : index
    %c0_42 = arith.constant 0 : index
    %30 = vector.load %arg4[%c0_41, %c0_42] : memref<16x1xf32, #tpu.memory_space<vmem>>, vector<16x1xf32>
    %31 = vector.broadcast %30 : vector<16x1xf32> to vector<16x1024xf32>
    %32 = arith.addf %29, %31 : vector<16x1024xf32>
    %cst_43 = arith.constant 0.00999999977 : f32
    %33 = vector.broadcast %cst_43 : f32 to vector<16x1024xf32>
    %34 = arith.mulf %33, %32 : vector<16x1024xf32>
    %35 = arith.maximumf %32, %34 : vector<16x1024xf32>
    %c0_44 = arith.constant 0 : index
    %c0_45 = arith.constant 0 : index
    %c0_46 = arith.constant 0 : index
    %36 = vector.load %arg5[%c0_44, %c0_45, %c0_46] : memref<1x16x1024xf32, #tpu.memory_space<vmem>>, vector<1x16x1024xf32>
    %37 = vector.shape_cast %36 : vector<1x16x1024xf32> to vector<16x1024xf32>
    %38 = vector.shape_cast %35 : vector<16x1024xf32> to vector<1x16x1024xf32>
    tpu.vector_store %arg5[%c0_44, %c0_45, %c0_46], %38 {strides = array<i32>} : memref<1x16x1024xf32, #tpu.memory_space<vmem>>, vector<1x16x1024xf32>,
    return
  }
  func.func @transform_0(%arg0: i32, %arg1: i32) -> (i32, i32, i32, i32) {
    %c0_i32 = arith.constant 0 : i32
    %c0_i32_0 = arith.constant 0 : i32
    %c0_i32_1 = arith.constant 0 : i32
    return %arg0, %arg1, %c0_i32, %c0_i32_0 : i32, i32, i32, i32
  }
  func.func @transform_1(%arg0: i32, %arg1: i32) -> (i32, i32) {
    %c0_i32 = arith.constant 0 : i32
    %c0_i32_0 = arith.constant 0 : i32
    %c0_i32_1 = arith.constant 0 : i32
    return %c0_i32, %c0_i32_0 : i32, i32
  }
  func.func @transform_2(%arg0: i32, %arg1: i32) -> (i32, i32) {
    %c0_i32 = arith.constant 0 : i32
    %c0_i32_0 = arith.constant 0 : i32
    %c0_i32_1 = arith.constant 0 : i32
    return %c0_i32, %c0_i32_0 : i32, i32
  }
  func.func @transform_3(%arg0: i32, %arg1: i32) -> (i32, i32, i32) {
    %c0_i32 = arith.constant 0 : i32
    %c0_i32_0 = arith.constant 0 : i32
    return %arg0, %c0_i32, %arg1 : i32, i32, i32
  }
}

</mosaic_0001>

<bundles_post_ra>
// kernel: tpu_custom_call.1
= control target key start
LH: loop header
LB: loop body
LE: loop exit
PB: predicated region body
PF: predicated region fallthrough
CT: control target
= control target key end

     0   :  { %8 = vsyncpa [#allocation4], 0  ;;  %s1819_s0 = inlined_call_operand.hbm [shape: bf16[2,2,8,1408], index: 0, kind: input, shape index: {}]   ;;  %s1820_s1 = inlined_call_operand.vmem [shape: bf16[16,72], index: 1, kind: input, shape index: {}]   ;;  %s1821_s2 = inlined_call_operand.vmem [shape: f32[16,1], index: 2, kind: input, shape index: {}]   ;;  %s1822_s3 = inlined_call_operand.hbm [shape: f32[2,16,2048], index: 3, kind: output, shape index: {}]  }
   0x1   :  { %10 = vsyncpa [#allocation4 + $0x1], 0 }
   0x2   :  { %11 = vsyncpa [#allocation5], 0 }
   0x3   :  { %13 = vsyncpa [#allocation5 + $0x1], 0  ;;  %s1377_s12 = smov 0   ;;  %s1379_s13 = smov 0  }
   0x4   :  { %s1381_s14 = smov 0   ;;  %s1383_s15 = smov 0  }
   0x5   :  { %s1385_s16 = smov 0   ;;  %s1387_s17 = smov 0  }
   0x6   :  { %s1389_s18 = smov 0   ;;  %s1391_s19 = smov 0  }
   0x7 LB: > { %1826 = sst [smem:[#allocation9_spill]] %s1343_s18  ;;  %s1070_s20 = sadd.s32 4294967295, %s1347_s19   ;;  %s1347_s19 = sphi %s1391_s19, %s19_s19   ;;  %s1343_s18 = sphi %s1389_s18, %s1837_s18   ;;  %s1339_s17 = sphi %s1387_s17, %s1842_s17   ;;  %s1335_s16 = sphi %s1385_s16, %s1835_s16   ;;  %s1331_s15 = sphi %s1383_s15, %s1841_s15   ;;  %s1327_s14 = sphi %s1381_s14, %s1840_s14   ;;  %s1323_s13 = sphi %s1379_s13, %s1839_s13   ;;  %s1319_s12 = sphi %s1377_s12, %s1838_s12  }
   0x8   : > { %s1071_s21 = sadd.s32 4294967294, %s1347_s19   ;;  %s28_s22 = sadd.s32 1, %s1339_s17 }
   0x9   : > { %s31_s23 = sadd.s32 1, %s1343_s18  ;;  %p29_p0 = scmp.ge.s32.totalorder %s28_s22, 2 }
   0xa   : > { %s40_s24 = sadd.s32 1, %s1327_s14  ;;  %p47_p1 = scmp.ne.s32.totalorder %s1327_s14, %s1323_s13 }
   0xb   : > { %p48_p2 = scmp.eq.s32.totalorder %s1347_s19, 0  ;;  %s1844_s22 = smov (%p29_p0, %s28_s22), 0 }
   0xc   : > { %1827 = sst [smem:[#allocation10_spill]] %s1844_s22  ;;  %s1846_s23 = smov (!%p29_p0, %s31_s23), %s1343_s18 }
   0xd   : > { %s36_s25 = ssub.s32 %s1339_s17, %s1844_s22  ;;  %p1430_p3 = por %p48_p2, %p47_p1 }
   0xe   : > { %p33_p4 = scmp.ge.s32.totalorder %s1846_s23, 2  ;;  %p53_p5 = scmp.ne.s32.totalorder %s1323_s13, %s1319_s12 }
   0xf   : > { %p54_p6 = scmp.eq.s32.totalorder %s1070_s20, 0  ;;  %p121_p7 = scmp.eq.s32.totalorder %s1070_s20, 3 }
  0x10   : > { %s1848_s23 = smov (%p33_p4, %s1846_s23), 0  ;;  %p127_p10 = scmp.eq.s32.totalorder %s1071_s21, 3 }
  0x11   : > { %1829 = sst [smem:[#allocation11_spill]] %s1848_s23  ;;  %p1438_p8 = por %p54_p6, %p53_p5 }
  0x12   : > { %p1442_p9 = por %p121_p7, %p47_p1  ;;  %s35_s29 = ssub.s32 %s1343_s18, %s1848_s23 }
  0x13   : > { %s37_s30 = sor.u32 %s36_s25, %s35_s29  ;;  %p1448_p12 = por %p127_p10, %p53_p5 }
  0x14   : > { %p38_p11 = scmp.eq.s32.totalorder %s37_s30, 0  ;;  %p1148_p13 = scmp.lt.s32.totalorder %s1347_s19, 4 }
  0x15   : > { %s1832_s4 = scalar_select %p1448_p12, 1, 0 }
  0x16   : > { %s153_s5 = sand.u32 1, %s1327_s14   ;;  %s1133_s8 = smul.u32 11, %s1339_s17 }
  0x17   : > { %s1455_s6 = scalar_select %p38_p11, %s1327_s14, %s40_s24  }
  0x18   : > { %s1132_s7 = smul.u32 44, %s153_s5  ;;  %p1460_p0 = pnand %p1148_p13, %p1430_p3 }
  0x19   : > { %s1134_s10 = smul.u32 22, %s1343_s18  ;;  %p1075_p1 = scmp.ge.s32.totalorder %s1347_s19, 1 }
  0x1a   : > { %s157_s11 = scalar_lea.vmem [#allocation3], %s1132_s7  ;;  %p172_p2 = scmp.lt.s32.totalorder %s1347_s19, 5 }
  0x1b   : > { %s167_s20 = sshll.u32 %s157_s11, 4  ;;  %s163_s21 = sadd.s32 %s1134_s10, %s1133_s8  ;;  %s168_s20 = int_to_ptr.vmem [resolvable:$true] %s167_s20 }
  0x1c   : > { %s1074_s25 = sshll.u32 %s163_s21, 6  ;;  %s154_s23 = scalar_lea.sflag [#allocation4], %s153_s5 }
  0x1d   : > { %s165_s24 = scalar_lea.hbm %s1819_s0, %s1074_s25  ;;  %p1225_p4 = pneg %p1460_p0 }
  0x1e   : > { %s1236_s26 = scalar_lea.vmem %s168_s20, 704  ;;  %s1349_s22 = smov [#allocation3]  }
  0x1f   : > { %p1237_p3 = scmp.ne.s32.totalorder %s168_s20, %s1236_s26  ;;  %s1241_s18 = sshll.u32 %s1349_s22, 4  ;;  %s1242_s18 = int_to_ptr.vmem [resolvable:$false] %s1241_s18 }
  0x20   : > { %s1243_s7 = scalar_lea.vmem %s1242_s18, 1408  ;;  %p1244_p7 = scmp.lt.s32.totalorder %s168_s20, %s1242_s18 }
  0x21   : > { %p1239_p5 = pnand %p1237_p3, %p1225_p4  ;;  %p1245_p10 = scmp.lt.s32.totalorder %s1243_s7, %s1236_s26 }
  0x23   : > { %p1240_p6 = pneg %p1239_p5  ;;  %p1246_p11 = por %p1245_p10, %p1244_p7 }
  0x25   : > { %p1247_p13 = pnand %p1246_p11, %p1240_p6 }
  0x27   : > { %1250 = shalt.err (!%p1247_p13)
}
  0x28   : > { %1143 = dma.hbm_to_vmem [thread:$0]  (!%p1460_p0), %s165_s24, 704, %s168_s20, %s154_s23  }
  0x29   : > { %p173_p12 = pnand %p1075_p1, %p172_p2 }
  0x2a   : > { %s1479_s5 = sand.u32 (!%p173_p12), 1, %s1323_s13  }
  0x2b   : > { %176 = sbr.rel (%p173_p12) target bundleno = 452 (0x1c4), region = 32  ;;  %s179_s22 = scalar_lea.sflag (!%p173_p12), [#allocation4], %s1479_s5 }
  0x2c   : > { %s1135_s18 = smul.u32 (!%p173_p12), 44, %s1479_s5 }
  0x2e   : > { %s1483_s8 = scalar_lea.vmem (!%p173_p12), [#allocation3], %s1135_s18 }
  0x30   : > { %1310 = dma.done.wait (%p1438_p8), %s179_s22, 704  }
  0x31   : > { %1312 = vsyncadd (%p1438_p8), %s179_s22, 4294966592  ;;  %v1490_v0 = vld [vmem:[%s1483_s8 + $0x18] sm:$0xff]  ;;  %v1493_v1 = vld [vmem:[%s1483_s8 + $0x8] sm:$0xff]  ;;  %s1350_s23 = smov 126   ;;  %s1351_s27 = smov 127   ;;  %v1352_v7 = vmov 0  }
  0x32   : > { %453 = vrot.lane.b32.xlu1 %v1490_v0, %s1350_s23  ;;  %449 = vrot.lane.b32.xlu0 %v1493_v1, %s1350_s23  ;;  %v1500_v2 = vld [vmem:[%s1483_s8 + $0x10] sm:$0xff]  ;;  %v1514_v4 = vld [vmem:[%s1483_s8 + $0x4] sm:$0xff]  ;;  %vm240_vm0 = vcmask 1043456   ;;  %vm284_vm1 = vcmask 1031168   ;;  %vm242_vm2 = vcmask 1039360   ;;  %vm715_vm3 = vcmask 588800  }
  0x33   : > { %v1511_v3 = vld [vmem:[%s1483_s8 + $0xc] sm:$0xff]  ;;  %v1521_v5 = vld [vmem:[%s1483_s8 + $0x14] sm:$0xff]  ;;  %v1532_v6 = vld [vmem:[%s1483_s8] sm:$0xff]  ;;  %776 = vmatprep.mubr.bf16.mxu0 %v1352_v7  ;;  %819 = vmatprep.mubr.bf16.mxu1 %v1352_v7  ;;  %s1076_s29 = sshll.u32 %s1479_s5, 7  ;;  %s1127_s24 = sshll.u32 %s1331_s15, 3 }
  0x34   : > { %1220 = vset.pattern.permute.xlu0 %v1352_v7  ;;  %1221 = vset.pattern.permute.xlu1 %v1352_v7  ;;  %v1551_v8 = vld [vmem:[%s1483_s8 + $0x20] sm:$0xff]  ;;  %v443_v9 = vld [vmem:[%s1483_s8 + $0x28] sm:$0xf]  ;;  %s1734_s30 = scalar_lea.vmem [#allocation6], %s1076_s29  ;;  %s1128_s26 = sshll.u32 %s1335_s16, 5 }
  0x35   : > { %v402_v10 = vld [vmem:[%s1483_s8 + $0x28] sm:$0xf]  ;;  %v1562_v11 = vld [vmem:[%s1483_s8 + $0x1c] sm:$0xff]  ;;  %v312_v12 = vld [vmem:[%s1483_s8 + $0x24] sm:$0xf]  ;;  %s977_s7 = sadd.s32 %s1128_s26, %s1127_s24  ;;  %s980_s16 = sshll.u32 %s1734_s30, 4  ;;  %s1763_s16 = int_to_ptr.vmem [resolvable:$true] %s980_s16 }
  0x36   : > { %451 = vrot.lane.b32.xlu0 %v1500_v2, %s1350_s23  ;;  %408 = vrot.lane.b32.xlu1 %v1493_v1, %s1351_s27  ;;  %v353_v13 = vld [vmem:[%s1483_s8 + $0x24] sm:$0xf]  ;;  %v262_v14 = vld [vmem:[%s1483_s8 + $0x20] sm:$0xf]  ;;  %s1129_s15 = sshll.u32 %s977_s7, 7  ;;  %s1353_s9 = smov [#allocation6]  }
  0x37   : > { %v219_v15 = vld [vmem:[%s1483_s8 + $0x20] sm:$0xf]  ;;  %s1760_s8 = scalar_lea.hbm %s1822_s3, %s1129_s15  ;;  %s1255_s10 = sshll.u32 %s1353_s9, 4  ;;  %s1256_s10 = int_to_ptr.vmem [resolvable:$false] %s1255_s10 }
  0x38   : > { %v518_v16 = vld [vmem:[%s1821_s2] sm:$0xff]  ;;  %v519_v17 = vld [vmem:[%s1821_s2 + $0x8] sm:$0xff]  ;;  %s1257_s11 = scalar_lea.vmem %s1256_s10, 4096  ;;  %p1258_p1 = scmp.lt.s32.totalorder %s1763_s16, %s1256_s10 }
  0x3a   : > { %410 = vrot.lane.b32.xlu0 %v1500_v2, %s1351_s27  ;;  %412 = vrot.lane.b32.xlu1 %v1490_v0, %s1351_s27 }
  0x3e   : > { %320 = vrot.lane.b32.xlu1 %v1511_v3, %s1351_s27  ;;  %318 = vrot.lane.b32.xlu0 %v1514_v4, %s1351_s27 }
  0x42   : > { %359 = vrot.lane.b32.xlu1 %v1514_v4, %s1350_s23  ;;  %322 = vrot.lane.b32.xlu0 %v1521_v5, %s1351_s27 }
  0x46   : > { %363 = vrot.lane.b32.xlu1 %v1521_v5, %s1350_s23  ;;  %361 = vrot.lane.b32.xlu0 %v1511_v3, %s1350_s23 }
  0x4a   : > { %270 = vrot.lane.b32.xlu1 %v1493_v1, %s1350_s23  ;;  %268 = vrot.lane.b32.xlu0 %v1532_v6, %s1350_s23 }
  0x4e   : > { %272 = vrot.lane.b32.xlu0 %v1500_v2, %s1350_s23  ;;  %225 = vrot.lane.b32.xlu1 %v1532_v6, %s1351_s27 }
  0x52   : > { %227 = vrot.lane.b32.xlu0 %v1493_v1, %s1351_s27  ;;  %229 = vrot.lane.b32.xlu1 %v1500_v2, %s1351_s27 }
  0x56   : > { %455 = vrot.lane.b32.xlu0 %v1551_v8, %s1350_s23  ;;  %457 = vrot.lane.b32.xlu1 %v443_v9, %s1350_s23 }
  0x5a   : > { %414 = vrot.lane.b32.xlu0 %v1551_v8, %s1351_s27  ;;  %416 = vrot.lane.b32.xlu1 %v402_v10, %s1351_s27 }
  0x5e   : > { %324 = vrot.lane.b32.xlu0 %v1562_v11, %s1351_s27  ;;  %326 = vrot.lane.b32.xlu1 %v312_v12, %s1351_s27 }
  0x62   : > { %365 = vrot.lane.b32.xlu0 %v1562_v11, %s1350_s23  ;;  %367 = vrot.lane.b32.xlu1 %v353_v13, %s1350_s23 }
  0x66   : > { %274 = vrot.lane.b32.xlu0 %v1490_v0, %s1350_s23  ;;  %276 = vrot.lane.b32.xlu1 %v262_v14, %s1350_s23  ;;  %s965_s23 = scalar_lea.sflag [#allocation5], %s1479_s5 }
  0x6a   : > { %231 = vrot.lane.b32.xlu0 %v1490_v0, %s1351_s27  ;;  %233 = vrot.lane.b32.xlu1 %v219_v15, %s1351_s27  ;;  %s1251_s27 = scalar_lea.vmem %s1763_s16, 2048 }
  0x6b   : > { %p1252_p8 = scmp.ne.s32.totalorder %s1763_s16, %s1251_s27  ;;  %p1259_p2 = scmp.lt.s32.totalorder %s1257_s11, %s1251_s27 }
  0x6d   : > { %p1253_p12 = pnand %p1252_p8, %p1442_p9  ;;  %p1260_p4 = por %p1259_p2, %p1258_p1 }
  0x6e   : > { %522 = vperm.xlu0 %1220, %v518_v16   ;;  %527 = vperm.xlu1 %1221, %v519_v17  }
  0x6f   : > { %p1254_p0 = pneg %p1253_p12 }
  0x71   : > { %p1261_p3 = pnand %p1260_p4, %p1254_p0 }
  0xa4   : > { %v1586_v18 = vpop.permute.xlu1 %453  ;;  %v450_v19 = vpop.permute.xlu0 %449 }
  0xa5   : > { %v461_v22 = vrot.slane %v1586_v18, 4  ;;  %v459_v23 = vrot.slane %v450_v19, 4 }
  0xa8   : > { %v452_v20 = vpop.permute.xlu0 %451  ;;  %v409_v21 = vpop.permute.xlu1 %408 }
  0xa9   : > { %v460_v24 = vrot.slane %v452_v20, 4  ;;  %v418_v28 = vrot.slane %v409_v21, 4 }
  0xab   : > { %v466_v25 = vsel %vm240_vm0, %v460_v24, %v461_v22  ;;  %v464_v26 = vsel %vm240_vm0, %v459_v23, %v460_v24 }
  0xac   : > { %v467_v27 = vsel %vm284_vm1, %v452_v20, %v466_v25  ;;  %v411_v29 = vpop.permute.xlu0 %410  ;;  %v1594_v30 = vpop.permute.xlu1 %412  ;;  %v465_v31 = vsel %vm284_vm1, %v450_v19, %v464_v26 }
  0xad   : > { %v419_v32 = vrot.slane %v411_v29, 4  ;;  %v420_v33 = vrot.slane %v1594_v30, 4  ;;  %v1111_v34 = vcombine.high %v465_v31, %v465_v31  ;;  %v1113_v35 = vcombine.high %v467_v27, %v467_v27 }
  0xae   : > { %v1110_v36 = vcombine.low %v465_v31, %v465_v31  ;;  %v1112_v37 = vcombine.low %v467_v27, %v467_v27 }
  0xaf   : > { %v423_v38 = vsel %vm240_vm0, %v418_v28, %v419_v32  ;;  %v425_v39 = vsel %vm240_vm0, %v419_v32, %v420_v33  ;;  %1118 = vmatprep.subr.msk.bf16.mxu0 %vm240_vm0, %v1111_v34  ;;  %1120 = vmatprep.subr.msk.bf16.mxu1 %vm240_vm0, %v1113_v35 }
  0xb0   : > { %v721_v40 = vsel %vm240_vm0, %v1110_v36, 0  ;;  %v727_v41 = vsel %vm240_vm0, %v1112_v37, 0  ;;  %v321_v42 = vpop.permute.xlu1 %320  ;;  %v319_v43 = vpop.permute.xlu0 %318  ;;  %v424_v44 = vsel %vm242_vm2, %v409_v21, %v423_v38  ;;  %v426_v45 = vsel %vm242_vm2, %v411_v29, %v425_v39 }
  0xb1   : > { %751 = vmatpush1.bf16.msra.mxu0 %v721_v40  ;;  %794 = vmatpush1.bf16.msra.mxu1 %v727_v41  ;;  %v1103_v46 = vcombine.high %v1493_v1, %v424_v44  ;;  %v1105_v47 = vcombine.high %v1500_v2, %v426_v45  ;;  %v1102_v48 = vcombine.low %v1493_v1, %v424_v44  ;;  %v329_v50 = vrot.slane %v321_v42, 4 }
  0xb2   : > { %v1104_v49 = vcombine.low %v1500_v2, %v426_v45  ;;  %v328_v51 = vrot.slane %v319_v43, 4 }
  0xb3   : > { %752 = vmatprep.subr.bf16.mxu0 %v1103_v46  ;;  %795 = vmatprep.subr.bf16.mxu1 %v1105_v47 }
  0xb4   : > { %v360_v52 = vpop.permute.xlu1 %359  ;;  %v1612_v53 = vpop.permute.xlu0 %322  ;;  %v333_v55 = vsel %vm240_vm0, %v328_v51, %v329_v50 }
  0xb5   : > { %753 = vmatpush1.bf16.msra.mxu0 %v1102_v48  ;;  %796 = vmatpush1.bf16.msra.mxu1 %v1104_v49  ;;  %v330_v54 = vrot.slane %v1612_v53, 4  ;;  %v369_v58 = vrot.slane %v360_v52, 4  ;;  %v334_v9 = vsel %vm242_vm2, %v319_v43, %v333_v55 }
  0xb7   : > { %v335_v60 = vsel %vm240_vm0, %v329_v50, %v330_v54 }
  0xb8   : > { %v1616_v56 = vpop.permute.xlu1 %363  ;;  %v362_v57 = vpop.permute.xlu0 %361  ;;  %v336_v10 = vsel %vm242_vm2, %v321_v42, %v335_v60 }
  0xb9   : > { %v371_v59 = vrot.slane %v1616_v56, 4  ;;  %v370_v61 = vrot.slane %v362_v57, 4 }
  0xbb   : > { %v374_v62 = vsel %vm240_vm0, %v369_v58, %v370_v61  ;;  %v376_v63 = vsel %vm240_vm0, %v370_v61, %v371_v59 }
  0xbc   : > { %v377_v12 = vsel %vm284_vm1, %v362_v57, %v376_v63  ;;  %v271_v13 = vpop.permute.xlu1 %270  ;;  %v269_v14 = vpop.permute.xlu0 %268  ;;  %v375_v15 = vsel %vm284_vm1, %v360_v52, %v374_v62  ;;  %v1663_v57 = vld [vmem:[%s1820_s1] sm:$0xff]  }
  0xbd   : > { %v1096_v16 = vcombine.low %v336_v10, %v377_v12  ;;  %v1097_v17 = vcombine.high %v336_v10, %v377_v12  ;;  %v279_v19 = vrot.slane %v271_v13, 4  ;;  %v278_v20 = vrot.slane %v269_v14, 4 }
  0xbe   : > { %v1095_v21 = vcombine.high %v334_v9, %v375_v15  ;;  %v1094_v23 = vcombine.low %v334_v9, %v375_v15 }
  0xbf   : > { %v283_v24 = vsel %vm240_vm0, %v278_v20, %v279_v19  ;;  %797 = vmatprep.subr.bf16.mxu1 %v1097_v17 }
  0xc0   : > { %v285_v25 = vsel %vm284_vm1, %v269_v14, %v283_v24  ;;  %754 = vmatprep.subr.bf16.mxu0 %v1095_v21  ;;  %798 = vmatpush1.bf16.msra.mxu1 %v1096_v16  ;;  %v1632_v26 = vpop.permute.xlu0 %272  ;;  %v226_v27 = vpop.permute.xlu1 %225 }
  0xc1   : > { %v1086_v28 = vcombine.low %v285_v25, %v1514_v4  ;;  %v1087_v29 = vcombine.high %v285_v25, %v1514_v4  ;;  %755 = vmatpush1.bf16.msra.mxu0 %v1094_v23  ;;  %v280_v31 = vrot.slane %v1632_v26, 4  ;;  %v235_v34 = vrot.slane %v226_v27, 4 }
  0xc3   : > { %v286_v32 = vsel %vm240_vm0, %v279_v19, %v280_v31  ;;  %756 = vmatprep.subr.bf16.mxu0 %v1087_v29 }
  0xc4   : > { %v228_v35 = vpop.permute.xlu0 %227  ;;  %v1640_v36 = vpop.permute.xlu1 %229  ;;  %v287_v37 = vsel %vm284_vm1, %v271_v13, %v286_v32 }
  0xc5   : > { %757 = vmatpush1.bf16.msra.mxu0 %v1086_v28  ;;  %v236_v38 = vrot.slane %v228_v35, 4  ;;  %v237_v39 = vrot.slane %v1640_v36, 4  ;;  %v1089_v4 = vcombine.high %v287_v37, %v1511_v3  ;;  %v1088_v40 = vcombine.low %v287_v37, %v1511_v3 }
  0xc7   : > { %v241_v41 = vsel %vm240_vm0, %v235_v34, %v236_v38  ;;  %v244_v42 = vsel %vm240_vm0, %v236_v38, %v237_v39  ;;  %799 = vmatprep.subr.bf16.mxu1 %v1089_v4 }
  0xc8   : > { %800 = vmatpush1.bf16.msra.mxu1 %v1088_v40  ;;  %v456_v43 = vpop.permute.xlu0 %455  ;;  %v458_v44 = vpop.permute.xlu1 %457  ;;  %v243_v45 = vsel %vm242_vm2, %v226_v27, %v241_v41  ;;  %v245_v46 = vsel %vm242_vm2, %v228_v35, %v244_v42 }
  0xc9   : > { %v462_v47 = vrot.slane %v456_v43, 4  ;;  %v463_v48 = vrot.slane %v458_v44, 4  ;;  %v1079_v49 = vcombine.high %v1532_v6, %v243_v45  ;;  %v1081_v3 = vcombine.high %v1493_v1, %v245_v46 }
  0xca   : > { %v1078_v50 = vcombine.low %v1532_v6, %v243_v45  ;;  %v1080_v51 = vcombine.low %v1493_v1, %v245_v46 }
  0xcb   : > { %v468_v52 = vsel %vm240_vm0, %v461_v22, %v462_v47  ;;  %v470_v55 = vsel %vm240_vm0, %v462_v47, %v463_v48  ;;  %758 = vmatprep.subr.bf16.mxu0 %v1079_v49  ;;  %801 = vmatprep.subr.bf16.mxu1 %v1081_v3 }
  0xcc   : > { %v471_v58 = vsel %vm284_vm1, %v456_v43, %v470_v55  ;;  %v415_v60 = vpop.permute.xlu0 %414  ;;  %v417_v61 = vpop.permute.xlu1 %416  ;;  %759 = vmatpush1.bf16.msra.mxu0 %v1078_v50  ;;  %802 = vmatpush1.bf16.msra.mxu1 %v1080_v51  ;;  %v469_v1 = vsel %vm284_vm1, %v1586_v18, %v468_v52 }
  0xcd   : > { %v421_v6 = vrot.slane %v415_v60, 4  ;;  %v422_v22 = vrot.slane %v417_v61, 4  ;;  %v1115_v62 = vcombine.high %v469_v1, %v469_v1  ;;  %v1117_v63 = vcombine.high %v471_v58, %v471_v58 }
  0xce   : > { %v1114_v9 = vcombine.low %v469_v1, %v469_v1  ;;  %v1116_v10 = vcombine.low %v471_v58, %v471_v58 }
  0xcf   : > { %v427_v12 = vsel %vm240_vm0, %v420_v33, %v421_v6  ;;  %v429_v13 = vsel %vm240_vm0, %v421_v6, %v422_v22  ;;  %1119 = vmatmul.mubr.msk.bf16.vlgmr.msra.gmra.mxu0 %vm715_vm3, %v1663_v57  ;;  %1121 = vmatmul.mubr.msk.bf16.vlgmr.msra.gmra.mxu1 %vm715_vm3, %v1663_v57 }
  0xd0   : > { %1122 = vmatprep.subr.msk.bf16.mxu0 %vm240_vm0, %v1115_v62  ;;  %1124 = vmatprep.subr.msk.bf16.mxu1 %vm240_vm0, %v1117_v63  ;;  %v325_v18 = vpop.permute.xlu0 %324  ;;  %v327_v14 = vpop.permute.xlu1 %326  ;;  %v733_v15 = vsel %vm240_vm0, %v1114_v9, 0  ;;  %v739_v16 = vsel %vm240_vm0, %v1116_v10, 0  ;;  %v428_v33 = vsel %vm242_vm2, %v1594_v30, %v427_v12  ;;  %v430_v17 = vsel %vm242_vm2, %v415_v60, %v429_v13 }
  0xd1   : > { %v331_v19 = vrot.slane %v325_v18, 4  ;;  %v332_v20 = vrot.slane %v327_v14, 4  ;;  %837 = vmatpush1.bf16.msra.mxu0 %v733_v15  ;;  %880 = vmatpush1.bf16.msra.mxu1 %v739_v16  ;;  %v1106_v21 = vcombine.low %v1490_v0, %v428_v33  ;;  %v1107_v23 = vcombine.high %v1490_v0, %v428_v33 }
  0xd2   : > { %v1108_v24 = vcombine.low %v1551_v8, %v430_v17  ;;  %v1109_v25 = vcombine.high %v1551_v8, %v430_v17  ;;  %862 = vmatprep.mubr.bf16.mxu0 %v1352_v7  ;;  %905 = vmatprep.mubr.bf16.mxu1 %v1352_v7 }
  0xd3   : > { %838 = vmatprep.subr.bf16.mxu0 %v1107_v23  ;;  %v337_v28 = vsel %vm240_vm0, %v330_v54, %v331_v19  ;;  %v339_v29 = vsel %vm240_vm0, %v331_v19, %v332_v20 }
  0xd4   : > { %881 = vmatprep.subr.bf16.mxu1 %v1109_v25  ;;  %v366_v30 = vpop.permute.xlu0 %365  ;;  %v368_v27 = vpop.permute.xlu1 %367  ;;  %v338_v38 = vsel %vm242_vm2, %v1612_v53, %v337_v28  ;;  %v340_v4 = vsel %vm242_vm2, %v325_v18, %v339_v29 }
  0xd5   : > { %v372_v32 = vrot.slane %v366_v30, 4  ;;  %v373_v34 = vrot.slane %v368_v27, 4  ;;  %839 = vmatpush1.bf16.msra.mxu0 %v1106_v21  ;;  %882 = vmatpush1.bf16.msra.mxu1 %v1108_v24 }
  0xd7   : > { %v378_v8 = vsel %vm240_vm0, %v371_v59, %v372_v32  ;;  %v380_v7 = vsel %vm240_vm0, %v372_v32, %v373_v34 }
  0xd8   : > { %v275_v35 = vpop.permute.xlu0 %274  ;;  %v277_v37 = vpop.permute.xlu1 %276  ;;  %v379_v54 = vsel %vm284_vm1, %v1616_v56, %v378_v8  ;;  %v381_v40 = vsel %vm284_vm1, %v366_v30, %v380_v7 }
  0xd9   : > { %v281_v41 = vrot.slane %v275_v35, 4  ;;  %v282_v42 = vrot.slane %v277_v37, 4  ;;  %v1098_v43 = vcombine.low %v338_v38, %v379_v54  ;;  %v1099_v44 = vcombine.high %v338_v38, %v379_v54 }
  0xda   : > { %v1100_v45 = vcombine.low %v340_v4, %v381_v40  ;;  %v1101_v59 = vcombine.high %v340_v4, %v381_v40 }
  0xdb   : > { %v288_v46 = vsel %vm240_vm0, %v280_v31, %v281_v41  ;;  %v290_v47 = vsel %vm240_vm0, %v281_v41, %v282_v42  ;;  %840 = vmatprep.subr.bf16.mxu0 %v1099_v44 }
  0xdc   : > { %883 = vmatprep.subr.bf16.mxu1 %v1101_v59  ;;  %v232_v53 = vpop.permute.xlu0 %231  ;;  %v234_v56 = vpop.permute.xlu1 %233  ;;  %841 = vmatpush1.bf16.msra.mxu0 %v1098_v43  ;;  %v289_v48 = vsel %vm284_vm1, %v1632_v26, %v288_v46  ;;  %v291_v49 = vsel %vm284_vm1, %v275_v35, %v290_v47 }
  0xdd   : > { %v238_v3 = vrot.slane %v232_v53, 4  ;;  %v239_v50 = vrot.slane %v234_v56, 4  ;;  %884 = vmatpush1.bf16.msra.mxu1 %v1100_v45  ;;  %v1090_v51 = vcombine.low %v289_v48, %v1521_v5  ;;  %v1091_v52 = vcombine.high %v289_v48, %v1521_v5 }
  0xde   : > { %v1092_v31 = vcombine.low %v291_v49, %v1562_v11  ;;  %v1093_v55 = vcombine.high %v291_v49, %v1562_v11 }
  0xdf   : > { %v246_v58 = vsel %vm240_vm0, %v237_v39, %v238_v3  ;;  %v248_v60 = vsel %vm240_vm0, %v238_v3, %v239_v50  ;;  %842 = vmatprep.subr.bf16.mxu0 %v1091_v52 }
  0xe0   : > { %885 = vmatprep.subr.bf16.mxu1 %v1093_v55  ;;  %843 = vmatpush1.bf16.msra.mxu0 %v1090_v51  ;;  %v247_v26 = vsel %vm242_vm2, %v1640_v36, %v246_v58  ;;  %v249_v61 = vsel %vm242_vm2, %v232_v53, %v248_v60 }
  0xe1   : > { %886 = vmatpush1.bf16.msra.mxu1 %v1092_v31  ;;  %v1082_v5 = vcombine.low %v1500_v2, %v247_v26  ;;  %v1083_v11 = vcombine.high %v1500_v2, %v247_v26  ;;  %v1084_v1 = vcombine.low %v1490_v0, %v249_v61  ;;  %v1085_v39 = vcombine.high %v1490_v0, %v249_v61 }
  0xe3   : > { %844 = vmatprep.subr.bf16.mxu0 %v1083_v11  ;;  %887 = vmatprep.subr.bf16.mxu1 %v1085_v39 }
  0xe4   : > { %845 = vmatpush1.bf16.msra.mxu0 %v1082_v5 }
  0xe5   : > { %888 = vmatpush1.bf16.msra.mxu1 %v1084_v1 }
  0xe7   : > { %1123 = vmatmul.mubr.msk.bf16.vlgmr.msra.gmra.mxu0 %vm715_vm3, %v1663_v57 }
  0xe8   : > { %1125 = vmatmul.mubr.msk.bf16.vlgmr.msra.gmra.mxu1 %vm715_vm3, %v1663_v57 }
  0xe9   : > { %v523_v36 = vpop.permute.xlu0 %522  ;;  %v1730_v18 = vpop.permute.xlu1 %527 }
 0x18f   : > { %v778_v6 = vpop.f32.mrf.mxu0  ;;  %v821_v22 = vpop.f32.mrf.mxu1 }
 0x190   : > { %v779_v62 = vadd.f32 %v778_v6, %v523_v36  ;;  %v822_v2 = vadd.f32 %v821_v22, %v523_v36 }
 0x191   : > { %v780_v63 = vpop.f32.mrf.mxu0  ;;  %v823_v9 = vpop.f32.mrf.mxu1 }
 0x192   : > { %v781_v10 = vadd.f32 %v780_v63, %v523_v36  ;;  %v824_v0 = vadd.f32 %v823_v9, %v523_v36  ;;  %v916_v12 = vmul.f32 0.01, %v779_v62  ;;  %v918_v13 = vmul.f32 0.01, %v822_v2 }
 0x193   : > { %v782_v14 = vpop.f32.mrf.mxu0  ;;  %v825_v15 = vpop.f32.mrf.mxu1 }
 0x194   : > { %v917_v16 = vmul.f32 0.01, %v781_v10  ;;  %v919_v33 = vmul.f32 0.01, %v824_v0  ;;  %v932_v17 = vmax.f32 %v779_v62, %v916_v12  ;;  %v934_v57 = vmax.f32 %v822_v2, %v918_v13 }
 0x195   : > { %v783_v19 = vadd.f32 %v782_v14, %v1730_v18  ;;  %v826_v20 = vadd.f32 %v825_v15, %v1730_v18  ;;  %v784_v21 = vpop.f32.mrf.mxu0  ;;  %v827_v23 = vpop.f32.mrf.mxu1 }
 0x196   : > { %v933_v24 = vmax.f32 %v781_v10, %v917_v16  ;;  %v935_v25 = vmax.f32 %v824_v0, %v919_v33  ;;  %948 = vst [vmem:[%s1734_s30] sm:$0xff] %v932_v17  ;;  %950 = vst [vmem:[%s1734_s30 + $0x10] sm:$0xff] %v934_v57  ;;  %v785_v30 = vadd.f32 %v784_v21, %v1730_v18 }
 0x197   : > { %v828_v27 = vadd.f32 %v827_v23, %v1730_v18  ;;  %v924_v28 = vmul.f32 0.01, %v783_v19  ;;  %v926_v29 = vmul.f32 0.01, %v826_v20 }
 0x198   : > { %949 = vst [vmem:[%s1734_s30 + $0x8] sm:$0xff] %v933_v24  ;;  %951 = vst [vmem:[%s1734_s30 + $0x18] sm:$0xff] %v935_v25  ;;  %v925_v32 = vmul.f32 0.01, %v785_v30 }
 0x199   : > { %v927_v34 = vmul.f32 0.01, %v828_v27  ;;  %v940_v8 = vmax.f32 %v783_v19, %v924_v28  ;;  %v942_v7 = vmax.f32 %v826_v20, %v926_v29 }
 0x19a   : > { %v941_v35 = vmax.f32 %v785_v30, %v925_v32 }
 0x19b   : > { %v943_v37 = vmax.f32 %v828_v27, %v927_v34  ;;  %956 = vst [vmem:[%s1734_s30 + $0x40] sm:$0xff] %v940_v8  ;;  %958 = vst [vmem:[%s1734_s30 + $0x50] sm:$0xff] %v942_v7 }
 0x19c   : > { %957 = vst [vmem:[%s1734_s30 + $0x48] sm:$0xff] %v941_v35 }
 0x19d   : > { %959 = vst [vmem:[%s1734_s30 + $0x58] sm:$0xff] %v943_v37 }
 0x1a7   : > { %v864_v38 = vpop.f32.mrf.mxu0 }
 0x1a8   : > { %v865_v54 = vadd.f32 %v864_v38, %v523_v36  ;;  %v907_v4 = vpop.f32.mrf.mxu1 }
 0x1a9   : > { %v908_v40 = vadd.f32 %v907_v4, %v523_v36  ;;  %v866_v41 = vpop.f32.mrf.mxu0 }
 0x1aa   : > { %v920_v42 = vmul.f32 0.01, %v865_v54  ;;  %v867_v43 = vadd.f32 %v866_v41, %v523_v36  ;;  %v909_v44 = vpop.f32.mrf.mxu1 }
 0x1ab   : > { %v922_v45 = vmul.f32 0.01, %v908_v40  ;;  %v910_v59 = vadd.f32 %v909_v44, %v523_v36  ;;  %v868_v46 = vpop.f32.mrf.mxu0 }
 0x1ac   : > { %v936_v47 = vmax.f32 %v865_v54, %v920_v42  ;;  %v921_v53 = vmul.f32 0.01, %v867_v43  ;;  %v869_v56 = vadd.f32 %v868_v46, %v1730_v18  ;;  %v911_v48 = vpop.f32.mrf.mxu1 }
 0x1ad   : > { %v938_v49 = vmax.f32 %v908_v40, %v922_v45  ;;  %v923_v3 = vmul.f32 0.01, %v910_v59  ;;  %v912_v50 = vadd.f32 %v911_v48, %v1730_v18  ;;  %v870_v51 = vpop.f32.mrf.mxu0 }
 0x1ae   : > { %952 = vst [vmem:[%s1734_s30 + $0x20] sm:$0xff] %v936_v47  ;;  %v937_v52 = vmax.f32 %v867_v43, %v921_v53  ;;  %v928_v31 = vmul.f32 0.01, %v869_v56  ;;  %v871_v55 = vadd.f32 %v870_v51, %v1730_v18  ;;  %v913_v58 = vpop.f32.mrf.mxu1 }
 0x1af   : > { %954 = vst [vmem:[%s1734_s30 + $0x30] sm:$0xff] %v938_v49  ;;  %v939_v60 = vmax.f32 %v910_v59, %v923_v3  ;;  %v930_v26 = vmul.f32 0.01, %v912_v50  ;;  %v914_v61 = vadd.f32 %v913_v58, %v1730_v18 }
 0x1b0   : > { %953 = vst [vmem:[%s1734_s30 + $0x28] sm:$0xff] %v937_v52  ;;  %v944_v5 = vmax.f32 %v869_v56, %v928_v31  ;;  %v929_v11 = vmul.f32 0.01, %v871_v55 }
 0x1b1   : > { %955 = vst [vmem:[%s1734_s30 + $0x38] sm:$0xff] %v939_v60  ;;  %v946_v1 = vmax.f32 %v912_v50, %v930_v26  ;;  %v931_v39 = vmul.f32 0.01, %v914_v61 }
 0x1b2   : > { %960 = vst [vmem:[%s1734_s30 + $0x60] sm:$0xff] %v944_v5  ;;  %v945_v36 = vmax.f32 %v871_v55, %v929_v11 }
 0x1b3   : > { %962 = vst [vmem:[%s1734_s30 + $0x70] sm:$0xff] %v946_v1  ;;  %v947_v6 = vmax.f32 %v914_v61, %v931_v39 }
 0x1b4   : > { %961 = vst [vmem:[%s1734_s30 + $0x68] sm:$0xff] %v945_v36 }
 0x1b5   : > { %963 = vst [vmem:[%s1734_s30 + $0x78] sm:$0xff] %v947_v6 }
 0x1b6   : > { %1264 = shalt.err (!%p1261_p3)
}
 0x1b7   : > { %s1265_s20 = scalar_lea.hbm %s1760_s8, 2048  ;;  %s1269_s29 = scalar_lea.hbm %s1822_s3, 8192 }
 0x1b8   : > { %p1266_p5 = scmp.ne.s32.totalorder %s1760_s8, %s1265_s20  ;;  %p1270_p10 = scmp.lt.s32.totalorder %s1760_s8, %s1822_s3 }
 0x1b9   : > { %p1271_p11 = scmp.lt.s32.totalorder %s1269_s29, %s1265_s20 }
 0x1ba   : > { %p1267_p6 = pnand %p1266_p5, %p1442_p9 }
 0x1bb   : > { %p1272_p13 = por %p1271_p11, %p1270_p10 }
 0x1bc   : > { %p1268_p7 = pneg %p1267_p6 }
 0x1be   : > { %p1273_p8 = pnand %p1272_p13, %p1268_p7 }
 0x1c0   : > { %1276 = shalt.err (!%p1273_p8)
}
 0x1c1   : > { %s1354_s26 = smov 1024   ;;  %s1355_s7 = smov 2048  }
 0x1c2   : > { %s1356_s15 = smov 64  }
 0x1c3   : > { %1138 = dma.vmem_to_hbm [thread:$0]  (%p1442_p9), %s1763_s16, 2048, %s1760_s8, %s965_s23, %s1354_s26, %s1355_s7, %s1356_s15  }
 0x1c4 PF: > { %p1149_p12 = scmp.ge.s32.totalorder %s1347_s19, 2  ;;  %s995_s18 = sand.u32 1, %s1319_s12  }
 0x1c5   : > { %p1834_p0 = scmp.ne.s32.totalorder %s1832_s4, 0  ;;  %s996_s22 = scalar_lea.sflag [#allocation5], %s995_s18 }
 0x1c7   : > { %p1145_p1 = pnand %p1149_p12, %p1834_p0 }
 0x1c9   : > { %p1146_p2 = pneg %p1145_p1 }
 0x1cb   : > { %1314 = dma.done.wait (%p1146_p2), %s996_s22, 2048  }
 0x1cc   : > { %1316 = vsyncadd (%p1146_p2), %s996_s22, 4294965248  ;;  %s19_s19 = sadd.s32 1, %s1347_s19   ;;  %s1835_s16 = sld [smem:[#allocation9_spill]] }
 0x1cd   : > { %p16_p4 = scmp.ge.s32.totalorder %s19_s19, 6   ;;  %s1836_s28 = sld [smem:[#allocation10_spill]] }
 0x1ce   : > { %s1837_s18 = sld [smem:[#allocation11_spill]]  ;;  %s1838_s12 = smov %s1323_s13 }
 0x1cf   : > { %s1839_s13 = smov %s1327_s14  ;;  %s1840_s14 = smov %s1455_s6 }
 0x1d0   : > { %s1841_s15 = smov %s1339_s17  ;;  %18 = sbr.rel (!%p16_p4) target bundleno = 7 (0x7), region = 77 }
 0x1d3   : > { %s1842_s17 = smov %s1836_s28 }
 0x1d5   :  { %1001 = vsyncpa [#allocation4], 1 }
 0x1d6   :  { %1003 = vsyncpa [#allocation4 + $0x1], 1 }
 0x1d7   :  { %1004 = vsyncpa [#allocation5], 1 }
 0x1d8   :  { %1006 = vsyncpa [#allocation5 + $0x1], 1 }

</bundles_post_ra>
